<compile_context>
chip_gen: v7x
topology: tpu7x:2x2x1
jax: 0.10.0
libtpu: 0.0.40
codegen_flags: <defaults>
</compile_context>

<pallas_src>
import math

import jax
import jax.numpy as jnp
import numpy as np
from jax.experimental import pallas as pl
from jax.experimental.pallas import tpu as pltpu

_LANES = 128   # vreg lane width
_SUB = 8       # vreg sublane count (f32)


def _kl_z_sum_kernel(mp_ref, mean_ref, logv_ref, out_ref, acc_ref):
    """Accumulates sum(logv + 1 - exp(logv) - (mean_prior - mean)^2)."""
    i = pl.program_id(0)

    @pl.when(i == 0)
    def _init():
        acc_ref[...] = jnp.zeros_like(acc_ref)

    mp = mp_ref[...].astype(jnp.float32)
    mean = mean_ref[...].astype(jnp.float32)
    logv = logv_ref[...].astype(jnp.float32)

    diff = mp - mean
    term = logv + 1.0 - jnp.exp(logv) - diff * diff            # (tile_rows, 128)

    # Partial reduce: fold the tile onto the resident (8, 128) accumulator with
    # pure elementwise vreg adds; defer the expensive cross-lane reduce.
    tile_rows = term.shape[0]
    acc_ref[...] += term.reshape(tile_rows // _SUB, _SUB, _LANES).sum(axis=0)

    @pl.when(i == pl.num_programs(0) - 1)
    def _finalize():
        out_ref[0, 0] = -0.5 * jnp.sum(acc_ref[...])


def _kl_z_sum_pallas(mean_prior, mean, logv, *, tile_rows=512):
    assert tile_rows % _SUB == 0
    n = math.prod(mean.shape)
    block_elems = tile_rows * _LANES
    n_pad = pl.cdiv(n, block_elems) * block_elems

    def lane_dense(x):
        flat = jnp.ravel(x)
        if n_pad != n:
            # zero padding contributes 0 to the sum: 0 + 1 - exp(0) - 0 == 0
            flat = jnp.pad(flat, (0, n_pad - n))
        return flat.reshape(n_pad // _LANES, _LANES)

    mp2 = lane_dense(mean_prior)
    m2 = lane_dense(mean)
    lv2 = lane_dense(logv)

    itemsize = jnp.dtype(mean.dtype).itemsize
    in_spec = pl.BlockSpec((tile_rows, _LANES), lambda i: (i, 0))

    out = pl.pallas_call(
        _kl_z_sum_kernel,
        out_shape=jax.ShapeDtypeStruct((1, 1), jnp.float32),
        grid=(n_pad // block_elems,),
        in_specs=[in_spec, in_spec, in_spec],
        out_specs=pl.BlockSpec((1, 1), lambda i: (0, 0),
                               memory_space=pltpu.SMEM),
        scratch_shapes=[pltpu.VMEM((_SUB, _LANES), jnp.float32)],
        compiler_params=pltpu.CompilerParams(
            dimension_semantics=("arbitrary",),
            vmem_limit_bytes=32 * 1024 * 1024,
        ),
        cost_estimate=pl.CostEstimate(
            flops=6 * n_pad,
            transcendentals=n_pad,
            bytes_accessed=3 * n_pad * itemsize + 4,
        ),
    )(mp2, m2, lv2)
    return out[0, 0]


def kl_loss_z_pallas(mean_prior, mean, logv, step, k, x0, anneal_func,
                     *, tile_rows=512, min_pallas_elems=16384):
    """Matches KL_loss_z.forward semantics: returns (loss, weight)."""
    assert mean_prior.shape == mean.shape == logv.shape

    n = math.prod(mean.shape)
    if n >= min_pallas_elems:
        loss = _kl_z_sum_pallas(mean_prior, mean, logv, tile_rows=tile_rows)
    else:
        # Tiny input: a pallas_call launch + SMEM readback costs more than the
        # whole reduction; let XLA fuse it instead.
        mp = mean_prior.astype(jnp.float32)
        m = mean.astype(jnp.float32)
        lv = logv.astype(jnp.float32)
        loss = -0.5 * jnp.sum(lv + 1.0 - jnp.exp(lv) - (mp - m) ** 2)

    # Annealing weight: pure host-side scalar math, same as the torch module.
    if anneal_func == 'logistic':
        weight = float(1.0 / (1.0 + np.exp(-k * (step - x0))))
    elif anneal_func == '':
        weight = min(1, step / x0)
    else:
        raise NotImplementedError

    return loss, weight


def _ref_loss(mean_prior, mean, logv):
    mp = mean_prior.astype(jnp.float32)
    m = mean.astype(jnp.float32)
    lv = logv.astype(jnp.float32)
    return -0.5 * jnp.sum(lv + 1.0 - jnp.exp(lv) - (mp - m) ** 2)


if __name__ == "__main__":
    key = jax.random.PRNGKey(0)
    keys = jax.random.split(key, 6)

    step, k, x0 = 100, 0.0025, 2500

    # (1) Small shapes consistent with the module (batch=2, latent=32); force
    #     the Pallas kernel so it is exercised even below the size threshold.
    b, d = 2, 32
    mp_s = jax.random.normal(keys[0], (b, d), dtype=jnp.float32)
    m_s = jax.random.normal(keys[1], (b, d), dtype=jnp.float32)
    lv_s = jax.random.normal(keys[2], (b, d), dtype=jnp.float32) * 0.1

    loss_s, w_s = kl_loss_z_pallas(mp_s, m_s, lv_s, step, k, x0, 'logistic',
                                   tile_rows=8, min_pallas_elems=0)
    loss_s = jax.block_until_ready(loss_s)
    ref_s = _ref_loss(mp_s, m_s, lv_s)
    assert jnp.allclose(loss_s, ref_s, rtol=1e-5, atol=1e-5), (loss_s, ref_s)
    ref_w = float(1.0 / (1.0 + np.exp(-k * (step - x0))))
    assert abs(w_s - ref_w) < 1e-12

    # (2) Same small inputs through the default dispatch (jnp fallback path).
    loss_fb, _ = kl_loss_z_pallas(mp_s, m_s, lv_s, step, k, x0, 'logistic')
    loss_fb = jax.block_until_ready(loss_fb)
    assert jnp.allclose(loss_fb, ref_s, rtol=1e-5, atol=1e-5), (loss_fb, ref_s)

    # (3) Larger, non-block-aligned shape: exercises multi-step tiling, the
    #     resident accumulator, and the zero-pad path (700*192 = 134400 elems
    #     -> 3 grid steps at tile_rows=512).
    B, D = 700, 192
    mp_l = jax.random.normal(keys[3], (B, D), dtype=jnp.float32)
    m_l = jax.random.normal(keys[4], (B, D), dtype=jnp.float32)
    lv_l = jax.random.normal(keys[5], (B, D), dtype=jnp.float32) * 0.1

    loss_l, w_l = kl_loss_z_pallas(mp_l, m_l, lv_l, step, k, x0, '')
    loss_l = jax.block_until_ready(loss_l)
    ref_l = _ref_loss(mp_l, m_l, lv_l)
    assert jnp.allclose(loss_l, ref_l, rtol=1e-4, atol=1e-2), (loss_l, ref_l)
    assert abs(w_l - min(1, step / x0)) < 1e-12

    print("KERNEL_OK")
</pallas_src>

<mosaic_0001>
module attributes {stable_mosaic.version = 11 : i64} {
  func.func @_kl_z_sum_kernel(%arg0: i32, %arg1: memref<8x128xf32, #tpu.memory_space<vmem>>, %arg2: memref<8x128xf32, #tpu.memory_space<vmem>>, %arg3: memref<8x128xf32, #tpu.memory_space<vmem>>, %arg4: memref<1x1xf32, #tpu.memory_space<smem>>, %arg5: memref<8x128xf32, #tpu.memory_space<vmem>>) attributes {dimension_semantics = [#tpu.dimension_semantics<arbitrary>], iteration_bounds = array<i64: 1>, scalar_prefetch = 0 : i64, scratch_operands = 1 : i64, tpu.core_type = #tpu.core_type<tc>, window_params = [{transform_indices = @transform_0, window_bounds = array<i64: 8, 128>}, {transform_indices = @transform_1, window_bounds = array<i64: 8, 128>}, {transform_indices = @transform_2, window_bounds = array<i64: 8, 128>}, {transform_indices = @transform_3, window_bounds = array<i64: 1, 1>}]} {
    %c0_i32 = arith.constant 0 : i32
    %0 = arith.cmpi eq, %arg0, %c0_i32 : i32
    %1 = arith.extui %0 : i1 to i32
    %c0_i32_0 = arith.constant 0 : i32
    %2 = arith.cmpi ne, %1, %c0_i32_0 : i32
    scf.if %2 {
      %cst_13 = arith.constant 0.000000e+00 : f32
      %21 = vector.broadcast %cst_13 : f32 to vector<8x128xf32>
      %c0_14 = arith.constant 0 : index
      %c0_15 = arith.constant 0 : index
      %22 = vector.load %arg5[%c0_14, %c0_15] : memref<8x128xf32, #tpu.memory_space<vmem>>, vector<8x128xf32>
      tpu.vector_store %arg5[%c0_14, %c0_15], %21 {strides = array<i32>} : memref<8x128xf32, #tpu.memory_space<vmem>>, vector<8x128xf32>,
    } else {
    }
    %c0 = arith.constant 0 : index
    %c0_1 = arith.constant 0 : index
    %3 = vector.load %arg1[%c0, %c0_1] : memref<8x128xf32, #tpu.memory_space<vmem>>, vector<8x128xf32>
    %c0_2 = arith.constant 0 : index
    %c0_3 = arith.constant 0 : index
    %4 = vector.load %arg2[%c0_2, %c0_3] : memref<8x128xf32, #tpu.memory_space<vmem>>, vector<8x128xf32>
    %c0_4 = arith.constant 0 : index
    %c0_5 = arith.constant 0 : index
    %5 = vector.load %arg3[%c0_4, %c0_5] : memref<8x128xf32, #tpu.memory_space<vmem>>, vector<8x128xf32>
    %6 = arith.subf %3, %4 : vector<8x128xf32>
    %cst = arith.constant 1.000000e+00 : f32
    %7 = vector.broadcast %cst : f32 to vector<8x128xf32>
    %8 = arith.addf %5, %7 : vector<8x128xf32>
    %9 = math.exp %5 : vector<8x128xf32>
    %10 = arith.subf %8, %9 : vector<8x128xf32>
    %11 = arith.mulf %6, %6 : vector<8x128xf32>
    %12 = arith.subf %10, %11 : vector<8x128xf32>
    %c0_6 = arith.constant 0 : index
    %c0_7 = arith.constant 0 : index
    %13 = vector.load %arg5[%c0_6, %c0_7] : memref<8x128xf32, #tpu.memory_space<vmem>>, vector<8x128xf32>
    %14 = vector.shape_cast %12 : vector<8x128xf32> to vector<1x8x128xf32>
    %cst_8 = arith.constant dense<0.000000e+00> : vector<8x128xf32>
    %15 = vector.multi_reduction <add>, %14, %cst_8 [0] : vector<1x8x128xf32> to vector<8x128xf32>
    %16 = arith.addf %13, %15 : vector<8x128xf32>
    %c0_9 = arith.constant 0 : index
    %c0_10 = arith.constant 0 : index
    %17 = vector.load %arg5[%c0_9, %c0_10] : memref<8x128xf32, #tpu.memory_space<vmem>>, vector<8x128xf32>
    tpu.vector_store %arg5[%c0_9, %c0_10], %16 {strides = array<i32>} : memref<8x128xf32, #tpu.memory_space<vmem>>, vector<8x128xf32>,
    %c0_i32_11 = arith.constant 0 : i32
    %18 = arith.cmpi eq, %arg0, %c0_i32_11 : i32
    %19 = arith.extui %18 : i1 to i32
    %c0_i32_12 = arith.constant 0 : i32
    %20 = arith.cmpi ne, %19, %c0_i32_12 : i32
    scf.if %20 {
      %c0_13 = arith.constant 0 : index
      %c0_14 = arith.constant 0 : index
      %21 = vector.load %arg5[%c0_13, %c0_14] : memref<8x128xf32, #tpu.memory_space<vmem>>, vector<8x128xf32>
      %22 = vector.shape_cast %21 : vector<8x128xf32> to vector<1x8x128xf32>
      %cst_15 = arith.constant dense<0.000000e+00> : vector<1xf32>
      %23 = vector.multi_reduction <add>, %22, %cst_15 [1, 2] : vector<1x8x128xf32> to vector<1xf32>
      %24 = vector.shape_cast %23 : vector<1xf32> to vector<1x1x1xf32>
      %25 = vector.extract %24[0, 0, 0] : f32 from vector<1x1x1xf32>
      %cst_16 = arith.constant -5.000000e-01 : f32
      %26 = arith.mulf %cst_16, %25 : f32
      %c0_17 = arith.constant 0 : index
      %c0_18 = arith.constant 0 : index
      %27 = memref.load %arg4[%c0_17, %c0_18] : memref<1x1xf32, #tpu.memory_space<smem>>
      memref.store %26, %arg4[%c0_17, %c0_18] : memref<1x1xf32, #tpu.memory_space<smem>>
    } else {
    }
    return
  }
  func.func @transform_0(%arg0: i32) -> (i32, i32) {
    %c0_i32 = arith.constant 0 : i32
    %c0_i32_0 = arith.constant 0 : i32
    return %arg0, %c0_i32 : i32, i32
  }
  func.func @transform_1(%arg0: i32) -> (i32, i32) {
    %c0_i32 = arith.constant 0 : i32
    %c0_i32_0 = arith.constant 0 : i32
    return %arg0, %c0_i32 : i32, i32
  }
  func.func @transform_2(%arg0: i32) -> (i32, i32) {
    %c0_i32 = arith.constant 0 : i32
    %c0_i32_0 = arith.constant 0 : i32
    return %arg0, %c0_i32 : i32, i32
  }
  func.func @transform_3(%arg0: i32) -> (i32, i32) {
    %c0_i32 = arith.constant 0 : i32
    %c0_i32_0 = arith.constant 0 : i32
    %c0_i32_1 = arith.constant 0 : i32
    return %c0_i32, %c0_i32_0 : i32, i32
  }
}

</mosaic_0001>

<bundles_post_ra>
// kernel: tpu_custom_call.1
= control target key start
LH: loop header
LB: loop body
LE: loop exit
PB: predicated region body
PF: predicated region fallthrough
CT: control target
= control target key end

     0   :  { %8 = vsyncpa [#allocation4], 0  ;;  %s262_s0 = inlined_call_operand.hbm [shape: f32[8,128], index: 0, kind: input, shape index: {}]   ;;  %s263_s1 = inlined_call_operand.hbm [shape: f32[8,128], index: 1, kind: input, shape index: {}]   ;;  %s264_s2 = inlined_call_operand.hbm [shape: f32[8,128], index: 2, kind: input, shape index: {}]   ;;  %s265_s3 = inlined_call_operand.hbm [shape: f32[1,1], index: 3, kind: output, shape index: {}]  }
   0x1   :  { %9 = vsyncpa [#allocation7], 0 }
   0x2   :  { %10 = vsyncpa [#allocation5], 0  ;;  %s190_s12 = smov [#allocation6]   ;;  %s191_s14 = smov [#allocation3]  }
   0x3   :  { %s27_s13 = sshll.u32 %s190_s12, 4  ;;  %s17_s15 = sshll.u32 %s191_s14, 4  ;;  %s28_s13 = int_to_ptr.vmem [resolvable:$true] %s27_s13  ;;  %s18_s15 = int_to_ptr.vmem [resolvable:$true] %s17_s15 }
   0x4   :  { %s108_s18 = scalar_lea.hbm %s263_s1, 128 }
   0x5   :  { %p109_p0 = scmp.ne.s32.totalorder %s263_s1, %s108_s18  ;;  %p112_p1 = scmp.lt.u32.totalorder %s108_s18, %s263_s1 }
   0x7   :  { %p114_p2 = pnand %p112_p1, %p109_p0 }
   0x9   :  { %117 = shalt.err (!%p114_p2)
}
   0xa   :  { %s118_s23 = scalar_lea.vmem %s28_s13, 128  ;;  %p123_p4 = scmp.lt.s32.totalorder %s28_s13, %s28_s13 }
   0xb   :  { %p119_p3 = scmp.ne.s32.totalorder %s28_s13, %s118_s23  ;;  %p124_p5 = scmp.lt.s32.totalorder %s118_s23, %s118_s23 }
   0xd   :  { %p125_p6 = por %p124_p5, %p123_p4 }
   0xf   :  { %p126_p7 = pnand %p125_p6, %p119_p3 }
  0x11   :  { %129 = shalt.err (!%p126_p7)
}
  0x12   :  { %30 = dma.hbm_to_vmem [thread:$0]  %s263_s1, 128, %s28_s13, [#allocation7]  }
  0x13   :  { %s130_s28 = scalar_lea.hbm %s262_s0, 128 }
  0x14   :  { %p131_p8 = scmp.ne.s32.totalorder %s262_s0, %s130_s28  ;;  %p134_p9 = scmp.lt.u32.totalorder %s130_s28, %s262_s0 }
  0x16   :  { %p136_p10 = pnand %p134_p9, %p131_p8 }
  0x18   :  { %139 = shalt.err (!%p136_p10)
}
  0x19   :  { %s140_s6 = scalar_lea.vmem %s18_s15, 128  ;;  %p145_p12 = scmp.lt.s32.totalorder %s18_s15, %s18_s15 }
  0x1a   :  { %p141_p11 = scmp.ne.s32.totalorder %s18_s15, %s140_s6  ;;  %p146_p13 = scmp.lt.s32.totalorder %s140_s6, %s140_s6 }
  0x1c   :  { %p147_p0 = por %p146_p13, %p145_p12 }
  0x1e   :  { %p148_p1 = pnand %p147_p0, %p141_p11 }
  0x20   :  { %151 = shalt.err (!%p148_p1)
}
  0x21   :  { %20 = dma.hbm_to_vmem [thread:$0]  %s262_s0, 128, %s18_s15, [#allocation4]  }
  0x22   :  { %s192_s8 = smov [#allocation8]   ;;  %s152_s12 = scalar_lea.hbm %s264_s2, 128 }
  0x23   :  { %s37_s9 = sshll.u32 %s192_s8, 4  ;;  %p153_p2 = scmp.ne.s32.totalorder %s264_s2, %s152_s12  ;;  %s38_s9 = int_to_ptr.vmem [resolvable:$true] %s37_s9 }
  0x24   :  { %p156_p3 = scmp.lt.u32.totalorder %s152_s12, %s264_s2 }
  0x26   :  { %p158_p4 = pnand %p156_p3, %p153_p2 }
  0x28   :  { %161 = shalt.err (!%p158_p4)
}
  0x29   :  { %s162_s18 = scalar_lea.vmem %s38_s9, 128  ;;  %p167_p6 = scmp.lt.s32.totalorder %s38_s9, %s38_s9 }
  0x2a   :  { %p163_p5 = scmp.ne.s32.totalorder %s38_s9, %s162_s18  ;;  %p168_p7 = scmp.lt.s32.totalorder %s162_s18, %s162_s18 }
  0x2c   :  { %p169_p8 = por %p168_p7, %p167_p6 }
  0x2e   :  { %p170_p9 = pnand %p169_p8, %p163_p5 }
  0x30   :  { %173 = shalt.err (!%p170_p9)
}
  0x31   :  { %40 = dma.hbm_to_vmem [thread:$0]  %s264_s2, 128, %s38_s9, [#allocation7]  }
  0x32   :  { %184 = dma.done.wait [#allocation4], 128  }
  0x33   :  { %185 = vsyncadd [#allocation4], 4294967168 }
  0x34   :  { %186 = dma.done.wait [#allocation7], 256  }
  0x35   :  { %187 = vsyncadd [#allocation7], 4294967040  ;;  %v57_v0 = vld [vmem:[#allocation8] sm:$0xff]  ;;  %v55_v2 = vld [vmem:[#allocation3] sm:$0xff]  ;;  %s174_s22 = scalar_lea.hbm %s265_s3, 16 }
  0x36   :  { %v60_v1 = vmul.f32 1.442695, %v57_v0  ;;  %v56_v3 = vld [vmem:[#allocation6] sm:$0xff]  ;;  %v59_v5 = vadd.f32 1.0, %v57_v0  ;;  %p175_p10 = scmp.ne.s32.totalorder %s265_s3, %s174_s22  ;;  %p178_p11 = scmp.lt.u32.totalorder %s174_s22, %s265_s3 }
  0x37   :  { %v58_v4 = vsub.f32 %v55_v2, %v56_v3 }
  0x38   :  { %106 = vpow2.f32 %v60_v1  ;;  %p180_p12 = pnand %p178_p11, %p175_p10 }
  0x39   :  { %v63_v6 = vmul.f32 %v58_v4, %v58_v4 }
  0x42   :  { %v107_v7 = vpop.eup %106 }
  0x43   :  { %v62_v8 = vsub.f32 %v59_v5, %v107_v7 }
  0x45   :  { %v64_v9 = vsub.f32 %v62_v8, %v63_v6 }
  0x47   :  { %73 = vadd.xlane.f32.xlu0 %v64_v9 }
  0xd4   :  { %v74_v10 = vpop.xlane.xlu0 %73 }
  0xd5   :  { %v75_v11 = vrot.slane %v74_v10, 4 }
  0xd7   :  { %v76_v12 = vadd.f32 %v75_v11, %v74_v10 }
  0xd9   :  { %v77_v13 = vrot.slane %v76_v12, 2 }
  0xdb   :  { %v78_v14 = vadd.f32 %v77_v13, %v76_v12 }
  0xdd   :  { %v79_v15 = vrot.slane %v78_v14, 1 }
  0xdf   :  { %v80_v16 = vadd.f32 %v79_v15, %v78_v14 }
  0xe1   :  { %100 = vpush %v80_v16 }
 0x112   :  { %s101_s2 = spop %100 }
 0x113   :  { %s82_s19 = smul.f32 -0.5, %s101_s2 }
 0x115   :  { %84 = sst [smem:[#allocation9]] %s82_s19 }
 0x116   :  { %183 = shalt.err (!%p180_p12)
}
 0x117   :  { %s193_s27 = smov [#allocation9]  }
 0x118   :  { %92 = dma.smem_to_hbm %s193_s27, 16, %s265_s3, [#allocation5]  }
 0x119   :  { %188 = dma.done.wait [#allocation5], 16  }
 0x11a   :  { %189 = vsyncadd [#allocation5], 4294967280 }
 0x11b   :  { %96 = sfence }
 0x11c   :  { %97 = vsyncpa [#allocation4], 1 }
 0x11d   :  { %98 = vsyncpa [#allocation7], 1 }
 0x11e   :  { %99 = vsyncpa [#allocation5], 1 }

</bundles_post_ra>
